<compile_context>
chip_gen: v7x
topology: tpu7x:2x2x1
jax: 0.10.0
libtpu: 0.0.40
codegen_flags: <defaults>
</compile_context>

<pallas_src>
import jax
import jax.numpy as jnp
from jax.experimental import pallas as pl
from jax.experimental.pallas import tpu as pltpu


def cbow_matmul_kernel(u_ref, lin_ref, out_ref):
    # u_ref:   (TM, E)  bf16  weighted context sums (precomputed in wrapper)
    # lin_ref: (TN, E)  bf16  tile of the output projection weight W_lin
    # out_ref: (TM, TN) f32   logits tile
    # z_tile = u @ W_tile.T without materializing the transpose: contract the
    # last dim of both operands (MXU consumes the transposed-RHS form natively).
    out_ref[...] = jax.lax.dot_general(
        u_ref[...],
        lin_ref[...],
        dimension_numbers=(((1,), (1,)), ((), ())),
        preferred_element_type=jnp.float32,
    ).astype(out_ref.dtype)


def cbow_forward(token_ids, emb_weight, ctx_weights, lin_weight, *, tn=256, tm_max=256):
    """token_ids: (B, C) int32; emb_weight: (V, E) f32; ctx_weights: (C,) or (C, E);
    lin_weight: (V, E) f32.  Returns logits (B, V) f32 (matmul done in bf16)."""
    B, C = token_ids.shape
    V, E = emb_weight.shape
    assert lin_weight.shape == (V, E)

    tn = min(tn, V)
    assert V % tn == 0, "V must be divisible by the output tile width tn"
    tm = B if B <= tm_max else tm_max
    assert B % tm == 0, "B must be divisible by the batch tile height tm"

    # ---- glue (indexing + tiny elementwise), fused by XLA ------------------
    # Note: jnp.take clamps out-of-range ids instead of erroring like PyTorch.
    e = jnp.take(emb_weight, token_ids, axis=0)                    # (B, C, E)
    if ctx_weights.ndim == 1:
        w = ctx_weights.reshape(1, C, 1).astype(e.dtype)
    else:                                                          # (C, E) "vector" weights
        w = ctx_weights.reshape(1, C, E).astype(e.dtype)
    u = jnp.sum(e * w, axis=1)                                     # (B, E) f32
    u_bf16 = u.astype(jnp.bfloat16)
    lin_bf16 = lin_weight.astype(jnp.bfloat16)                     # halve streamed HBM bytes

    # ---- kernel: tiled (B, E) x (V, E)^T matmul ----------------------------
    grid = (V // tn, B // tm)   # batch axis innermost -> W_lin tile stays VMEM-resident
    return pl.pallas_call(
        cbow_matmul_kernel,
        out_shape=jax.ShapeDtypeStruct((B, V), jnp.float32),
        grid_spec=pltpu.PrefetchScalarGridSpec(
            num_scalar_prefetch=0,
            grid=grid,
            in_specs=[
                pl.BlockSpec((tm, E), lambda j, b: (b, 0)),        # u tile
                pl.BlockSpec((tn, E), lambda j, b: (j, 0)),        # W_lin tile (bf16)
            ],
            out_specs=pl.BlockSpec((tm, tn), lambda j, b: (b, j)),
        ),
        compiler_params=pltpu.CompilerParams(
            # Both axes are independent output tiles -> safe to shard across
            # TensorCores on megacore / v7x.
            dimension_semantics=("parallel", "parallel"),
            vmem_limit_bytes=32 * 1024 * 1024,
        ),
    )(u_bf16, lin_bf16)


if __name__ == "__main__":
    # Small, kernel-friendly sizes consistent with the module.
    V = 1024         # num_embeddings
    E = 128          # embedding_dim
    C = 6            # num_context_words
    B = 8            # batch

    key = jax.random.PRNGKey(0)
    k_emb, k_lin, k_ids = jax.random.split(key, 3)

    # nn.Embedding init, then the module's padding-row trick:
    #   emb.weight[0] = emb.weight[1:].sum(0) / num_embeddings
    emb_weight = jax.random.uniform(k_emb, (V, E), dtype=jnp.float32)
    emb_weight = emb_weight.at[0].set(emb_weight[1:].sum(axis=0) / V)

    # nn.Linear(E, V, bias=False) weight: shape (V, E).
    lin_weight = jax.random.uniform(k_lin, (V, E), dtype=jnp.float32) * 0.1

    # weights=None, vector=None  ->  torch.ones(num_context_words)
    ctx_weights = jnp.ones((C,), dtype=jnp.float32)

    token_ids = jax.random.randint(k_ids, (B, C), 0, V, dtype=jnp.int32)

    z = cbow_forward(token_ids, emb_weight, ctx_weights, lin_weight)
    z = jax.block_until_ready(z)

    # Pure-JAX f32 reference (module semantics). The kernel does the matmul in
    # bf16 (f32 accumulation), so tolerances reflect bf16 operand rounding.
    e_ref = jnp.take(emb_weight, token_ids, axis=0)
    u_ref = jnp.sum(e_ref * ctx_weights.reshape(1, C, 1), axis=1)
    z_ref = u_ref @ lin_weight.T
    assert z.shape == (B, V)
    assert jnp.allclose(z, z_ref, rtol=2e-2, atol=1e-1)

    print("KERNEL_OK")
</pallas_src>

<mosaic_0001>
module attributes {stable_mosaic.version = 11 : i64} {
  func.func @cbow_matmul_kernel(%arg0: i32, %arg1: i32, %arg2: memref<8x128xbf16, #tpu.memory_space<vmem>>, %arg3: memref<256x128xbf16, #tpu.memory_space<vmem>>, %arg4: memref<8x256xf32, #tpu.memory_space<vmem>>) attributes {dimension_semantics = [#tpu.dimension_semantics<parallel>, #tpu.dimension_semantics<parallel>], iteration_bounds = array<i64: 4, 1>, scalar_prefetch = 0 : i64, scratch_operands = 0 : i64, tpu.core_type = #tpu.core_type<tc>, window_params = [{transform_indices = @transform_0, window_bounds = array<i64: 8, 128>}, {transform_indices = @transform_1, window_bounds = array<i64: 256, 128>}, {transform_indices = @transform_2, window_bounds = array<i64: 8, 256>}]} {
    %c0 = arith.constant 0 : index
    %c0_0 = arith.constant 0 : index
    %0 = vector.load %arg2[%c0, %c0_0] : memref<8x128xbf16, #tpu.memory_space<vmem>>, vector<8x128xbf16>
    %c0_1 = arith.constant 0 : index
    %c0_2 = arith.constant 0 : index
    %1 = vector.load %arg3[%c0_1, %c0_2] : memref<256x128xbf16, #tpu.memory_space<vmem>>, vector<256x128xbf16>
    %cst = arith.constant dense<0.000000e+00> : vector<8x256xf32>
    %2 = tpu.matmul %0, %1, %cst {dimension_numbers = #tpu.dot_dimension_numbers<[1], [1], [0], [0], [0, 0, 1, 0], [], []>} : vector<8x128xbf16>, vector<256x128xbf16>, vector<8x256xf32> -> vector<8x256xf32>
    %c0_3 = arith.constant 0 : index
    %c0_4 = arith.constant 0 : index
    %3 = vector.load %arg4[%c0_3, %c0_4] : memref<8x256xf32, #tpu.memory_space<vmem>>, vector<8x256xf32>
    tpu.vector_store %arg4[%c0_3, %c0_4], %2 {strides = array<i32>} : memref<8x256xf32, #tpu.memory_space<vmem>>, vector<8x256xf32>,
    return
  }
  func.func @transform_0(%arg0: i32, %arg1: i32) -> (i32, i32) {
    %c0_i32 = arith.constant 0 : i32
    %c0_i32_0 = arith.constant 0 : i32
    return %arg1, %c0_i32 : i32, i32
  }
  func.func @transform_1(%arg0: i32, %arg1: i32) -> (i32, i32) {
    %c0_i32 = arith.constant 0 : i32
    %c0_i32_0 = arith.constant 0 : i32
    return %arg0, %c0_i32 : i32, i32
  }
  func.func @transform_2(%arg0: i32, %arg1: i32) -> (i32, i32) {
    %c0_i32 = arith.constant 0 : i32
    return %arg1, %arg0 : i32, i32
  }
}

</mosaic_0001>

<bundles_post_ra>
// kernel: tpu_custom_call.1
= control target key start
LH: loop header
LB: loop body
LE: loop exit
PB: predicated region body
PF: predicated region fallthrough
CT: control target
= control target key end

     0   :  { %7 = vsyncpa [#allocation3], 0  ;;  %s1029_s0 = inlined_call_operand.hbm [shape: bf16[8,128], index: 0, kind: input, shape index: {}]   ;;  %s1030_s1 = inlined_call_operand.hbm [shape: bf16[1024,128], index: 1, kind: input, shape index: {}]   ;;  %s1031_s2 = inlined_call_operand.hbm [shape: f32[8,1024], index: 2, kind: output, shape index: {}]  }
   0x1   :  { %8 = vsyncpa [#allocation6], 0 }
   0x2   :  { %10 = vsyncpa [#allocation6 + $0x1], 0 }
   0x3   :  { %11 = vsyncpa [#allocation4], 0 }
   0x4   :  { %13 = vsyncpa [#allocation4 + $0x1], 0  ;;  %s793_s9 = smov 0   ;;  %s795_s10 = smov 0  }
   0x5   :  { %s797_s11 = smov 0   ;;  %s799_s12 = smov 0  }
   0x6   :  { %s801_s13 = smov 0   ;;  %s803_s14 = smov 0  }
   0x7 LB: > { %s483_s15 = sadd.s32 4294967295, %s771_s14   ;;  %s484_s16 = sadd.s32 4294967294, %s771_s14   ;;  %s771_s14 = sphi %s803_s14, %s19_s14   ;;  %s767_s13 = sphi %s801_s13, %s1058_s13   ;;  %s763_s12 = sphi %s799_s12, %s1057_s12   ;;  %s759_s11 = sphi %s797_s11, %s1056_s11   ;;  %s755_s10 = sphi %s795_s10, %s1055_s10   ;;  %s751_s9 = sphi %s793_s9, %s1054_s9  }
   0x8   : > { %s64_s17 = sadd.s32 1, %s759_s11  ;;  %p71_p0 = scmp.ne.s32.totalorder %s759_s11, %s755_s10 }
   0x9   : > { %p72_p1 = scmp.eq.s32.totalorder %s771_s14, 0  ;;  %p77_p2 = scmp.ne.s32.totalorder %s755_s10, %s751_s9 }
   0xa   : > { %p831_p3 = scmp.eq.s32.totalorder %s483_s15, 0  ;;  %p103_p4 = scmp.eq.s32.totalorder %s483_s15, 3 }
   0xb   : > { %p835_p5 = por %p72_p1, %p71_p0  ;;  %p109_p6 = scmp.eq.s32.totalorder %s484_s16, 3 }
   0xc   : > { %s1038_s18 = scalar_select %p831_p3, 1, 0 }
   0xd   : > { %p841_p7 = por %p831_p3, %p77_p2  ;;  %p845_p8 = por %p103_p4, %p71_p0 }
   0xe   : > { %p849_p9 = por %p109_p6, %p77_p2  ;;  %p485_p10 = scmp.ge.s32.totalorder %s771_s14, 1 }
   0xf   : > { %s1040_s20 = scalar_select %p841_p7, 1, 0 }
  0x10   : > { %s1041_s21 = scalar_select %p845_p8, 1, 0 }
  0x11   : > { %s1042_s22 = scalar_select %p849_p9, 1, 0 }
  0x12   : > { %p116_p11 = scmp.lt.s32.totalorder %s771_s14, 5  ;;  %s773_s24 = smov [#allocation2]  }
  0x13   : > { %s131_s25 = sshll.u32 %s773_s24, 4  ;;  %p557_p13 = scmp.lt.s32.totalorder %s771_s14, 4  ;;  %s132_s25 = int_to_ptr.vmem [resolvable:$true] %s131_s25 }
  0x14   : > { %p855_p12 = pnand %p485_p10, %p116_p11  ;;  %s31_s28 = sadd.s32 1, %s767_s13 }
  0x15   : > { %p864_p1 = pnand %p557_p13, %p835_p5  ;;  %p875_p4 = scmp.ge.s32.totalorder %s31_s28, 4 }
  0x16   : > { %s1043_s23 = scalar_select %p855_p12, 1, 0 }
  0x17   : > { %p544_p0 = pneg %p855_p12  ;;  %s142_s30 = sand.u32 1, %s759_s11  }
  0x18   : > { %s1044_s26 = scalar_select %p864_p1, 1, 0 }
  0x19   : > { %p870_p2 = pnand %p544_p0, %p831_p3  ;;  %s627_s5 = scalar_lea.hbm %s1029_s0, 64 }
  0x1a   : > { %s1046_s29 = scalar_select %p875_p4, 1, 0 }
  0x1b   : > { %p628_p5 = scmp.ne.s32.totalorder %s1029_s0, %s627_s5  ;;  %p629_p6 = pneg %p870_p2 }
  0x1c   : > { %p634_p13 = scmp.lt.u32.totalorder %s627_s5, %s1029_s0 }
  0x1d   : > { %p630_p10 = pnand %p629_p6, %p628_p5 }
  0x1f   : > { %p631_p11 = pneg %p630_p10 }
  0x21   : > { %p636_p0 = pnand %p634_p13, %p631_p11 }
  0x23   : > { %639 = shalt.err (!%p636_p0)
}
  0x24   : > { %s640_s16 = scalar_lea.vmem %s132_s25, 64  ;;  %p648_p3 = scmp.lt.s32.totalorder %s132_s25, %s132_s25 }
  0x25   : > { %p641_p9 = scmp.ne.s32.totalorder %s132_s25, %s640_s16  ;;  %p649_p12 = scmp.lt.s32.totalorder %s640_s16, %s640_s16 }
  0x27   : > { %p643_p8 = pnand %p641_p9, %p629_p6  ;;  %p650_p1 = por %p649_p12, %p648_p3 }
  0x29   : > { %p644_p7 = pneg %p643_p8 }
  0x2b   : > { %p651_p4 = pnand %p650_p1, %p644_p7 }
  0x2d   : > { %654 = shalt.err (!%p651_p4)
}
  0x2e   : > { %547 = dma.hbm_to_vmem [thread:$0]  (!%p870_p2), %s1029_s0, 64, %s132_s25, [#allocation3]  }
  0x2f   : > { %p1047_p9 = scmp.ne.s32.totalorder %s1046_s29, 0  ;;  %s488_s3 = sshll.u32 %s142_s30, 7 }
  0x30   : > { %s516_s5 = sshll.u32 %s767_s13, 11  ;;  %s146_s8 = scalar_lea.vmem [#allocation5], %s488_s3 }
  0x31   : > { %s1060_s28 = smov (%p1047_p9, %s31_s28), 0  ;;  %s906_s7 = scalar_lea.hbm %s1030_s1, %s516_s5 }
  0x32   : > { %s61_s4 = ssub.s32 %s767_s13, %s1060_s28  ;;  %s153_s15 = sshll.u32 %s146_s8, 4  ;;  %s913_s15 = int_to_ptr.vmem [resolvable:$true] %s153_s15 }
  0x33   : > { %p62_p3 = scmp.eq.s32.totalorder %s61_s4, 0  ;;  %s915_s29 = scalar_lea.sflag [#allocation6], %s142_s30 }
  0x34   : > { %s655_s16 = scalar_lea.hbm %s906_s7, 2048  ;;  %p1048_p8 = scmp.ne.s32.totalorder %s1044_s26, 0 }
  0x35   : > { %s911_s25 = scalar_select %p62_p3, %s759_s11, %s64_s17  }
  0x36   : > { %p656_p7 = scmp.ne.s32.totalorder %s906_s7, %s655_s16  ;;  %p657_p12 = pneg %p1048_p8 }
  0x37   : > { %s660_s3 = scalar_lea.hbm %s1030_s1, 8192  ;;  %p661_p4 = scmp.lt.u32.totalorder %s906_s7, %s1030_s1 }
  0x38   : > { %p658_p1 = pnand %p657_p12, %p656_p7  ;;  %p662_p5 = scmp.lt.u32.totalorder %s660_s3, %s655_s16 }
  0x39   : > { %p664_p10 = scmp.lt.u32.totalorder %s655_s16, %s906_s7 }
  0x3a   : > { %p659_p2 = pneg %p658_p1  ;;  %p663_p6 = por %p662_p5, %p661_p4 }
  0x3c   : > { %p665_p11 = por %p664_p10, %p663_p6 }
  0x3e   : > { %p666_p13 = pnand %p665_p11, %p659_p2 }
  0x40   : > { %669 = shalt.err (!%p666_p13)
}
  0x41   : > { %s670_s17 = scalar_lea.vmem %s913_s15, 2048  ;;  %s774_s30 = smov [#allocation5]  }
  0x42   : > { %p671_p0 = scmp.ne.s32.totalorder %s913_s15, %s670_s17  ;;  %s675_s27 = sshll.u32 %s774_s30, 4  ;;  %s676_s27 = int_to_ptr.vmem [resolvable:$false] %s675_s27 }
  0x43   : > { %s677_s6 = scalar_lea.vmem %s676_s27, 4096  ;;  %p678_p7 = scmp.lt.s32.totalorder %s913_s15, %s676_s27 }
  0x44   : > { %p673_p9 = pnand %p671_p0, %p657_p12  ;;  %p679_p1 = scmp.lt.s32.totalorder %s677_s6, %s670_s17 }
  0x46   : > { %p674_p3 = pneg %p673_p9  ;;  %p680_p4 = por %p679_p1, %p678_p7 }
  0x48   : > { %p681_p5 = pnand %p680_p4, %p674_p3 }
  0x4a   : > { %684 = shalt.err (!%p681_p5)
}
  0x4b   : > { %s775_s8 = smov 64   ;;  %s776_s16 = smov 4  }
  0x4c   : > { %551 = dma.hbm_to_vmem [thread:$0]  (!%p1048_p8), %s906_s7, 2048, %s913_s15, %s915_s29, %s775_s8, %s775_s8, %s776_s16  }
  0x4d   : > { %p1049_p12 = scmp.ne.s32.totalorder %s1043_s23, 0 }
  0x4e   : > { %p1050_p2 = scmp.ne.s32.totalorder (!%p1049_p12), %s1038_s18, 0 }
  0x4f   : > { %165 = sbr.rel (%p1049_p12) target bundleno = 384 (0x180), region = 28 }
  0x56   : > { %738 = dma.done.wait (%p1050_p2), [#allocation3], 64  }
  0x57   : > { %740 = vsyncadd (%p1050_p2), [#allocation3], 4294967232  ;;  %s950_s19 = sand.u32 1, %s755_s10   ;;  %p1051_p8 = scmp.ne.s32.totalorder %s1040_s20, 0 }
  0x58   : > { %s493_s24 = sshll.u32 %s950_s19, 7  ;;  %s172_s3 = scalar_lea.sflag [#allocation6], %s950_s19 }
  0x59   : > { %s954_s4 = scalar_lea.vmem [#allocation5], %s493_s24 }
  0x5a   : > { %742 = dma.done.wait (%p1051_p8), %s172_s3, 2048  }
  0x5b   : > { %744 = vsyncadd (%p1051_p8), %s172_s3, 4294965248  ;;  %v611_v0 = vld [vmem:[%s954_s4 + $0x40] sm:$0xff]   ;;  %v613_v2 = vld [vmem:[%s954_s4 + $0x48] sm:$0xff]   ;;  %s494_s18 = sshll.u32 %s950_s19, 4  ;;  %s517_s26 = sshll.u32 %s763_s12, 8 }
  0x5c   : > { %v612_v1 = vld [vmem:[%s954_s4] sm:$0xff]   ;;  %518 = vmatprep.subr.bf16.mxu0 %v611_v0  ;;  %v614_v3 = vld [vmem:[%s954_s4 + $0x8] sm:$0xff]   ;;  %v615_v4 = vld [vmem:[%s954_s4 + $0x50] sm:$0xff]   ;;  %s195_s20 = scalar_lea.vmem [#allocation7], %s494_s18  ;;  %s983_s29 = scalar_lea.hbm %s1031_s2, %s517_s26 }
  0x5d   : > { %519 = vmatpush3.bf16.xpose.msra.mxu0 %v612_v1  ;;  %v616_v5 = vld [vmem:[%s954_s4 + $0x10] sm:$0xff]   ;;  %v617_v6 = vld [vmem:[%s954_s4 + $0x58] sm:$0xff]   ;;  %v619_v9 = vld [vmem:[%s954_s4 + $0x60] sm:$0xff]   ;;  %s388_s23 = sshll.u32 %s195_s20, 4  ;;  %s372_s5 = scalar_lea.sflag [#allocation4], %s950_s19  ;;  %s978_s23 = int_to_ptr.vmem [resolvable:$true] %s388_s23 }
  0x5e   : > { %520 = vmatprep.subr.bf16.mxu0 %v613_v2  ;;  %v199_v7 = vld [vmem:[#allocation2] sm:$0xf]  ;;  %v620_v10 = vld [vmem:[%s954_s4 + $0x20] sm:$0xff]   ;;  %v621_v11 = vld [vmem:[%s954_s4 + $0x68] sm:$0xff]   ;;  %s685_s17 = scalar_lea.vmem %s978_s23, 256  ;;  %p1052_p10 = scmp.ne.s32.totalorder %s1041_s21, 0 }
  0x5f   : > { %534 = vmatprep.mubr.bf16.mxu0 %v199_v7  ;;  %v618_v8 = vld [vmem:[%s954_s4 + $0x18] sm:$0xff]   ;;  %v622_v12 = vld [vmem:[%s954_s4 + $0x28] sm:$0xff]   ;;  %v623_v13 = vld [vmem:[%s954_s4 + $0x70] sm:$0xff]   ;;  %p686_p6 = scmp.ne.s32.totalorder %s978_s23, %s685_s17  ;;  %s777_s12 = smov [#allocation7]  }
  0x60   : > { %v624_v14 = vld [vmem:[%s954_s4 + $0x30] sm:$0xff]   ;;  %v625_v15 = vld [vmem:[%s954_s4 + $0x78] sm:$0xff]   ;;  %s689_s30 = sshll.u32 %s777_s12, 4  ;;  %s690_s30 = int_to_ptr.vmem [resolvable:$false] %s689_s30 }
  0x61   : > { %v626_v16 = vld [vmem:[%s954_s4 + $0x38] sm:$0xff]   ;;  %p687_p11 = pnand %p686_p6, %p1052_p10  ;;  %s691_s27 = scalar_lea.vmem %s690_s30, 512 }
  0x62   : > { %p692_p0 = scmp.lt.s32.totalorder %s978_s23, %s690_s30  ;;  %p693_p9 = scmp.lt.s32.totalorder %s691_s27, %s685_s17 }
  0x63   : > { %p688_p13 = pneg %p687_p11 }
  0x64   : > { %p694_p3 = por %p693_p9, %p692_p0 }
  0x65   : > { %521 = vmatpush3.bf16.xpose.msra.mxu0 %v614_v3 }
  0x66   : > { %522 = vmatprep.subr.bf16.mxu0 %v615_v4  ;;  %p695_p7 = pnand %p694_p3, %p688_p13 }
  0x6d   : > { %523 = vmatpush3.bf16.xpose.msra.mxu0 %v616_v5 }
  0x6e   : > { %524 = vmatprep.subr.bf16.mxu0 %v617_v6 }
  0x75   : > { %525 = vmatpush3.bf16.xpose.msra.mxu0 %v618_v8 }
  0x76   : > { %526 = vmatprep.subr.bf16.mxu0 %v619_v9 }
  0x7d   : > { %527 = vmatpush3.bf16.xpose.msra.mxu0 %v620_v10 }
  0x7e   : > { %528 = vmatprep.subr.bf16.mxu0 %v621_v11 }
  0x85   : > { %529 = vmatpush3.bf16.xpose.msra.mxu0 %v622_v12 }
  0x86   : > { %530 = vmatprep.subr.bf16.mxu0 %v623_v13 }
  0x8d   : > { %531 = vmatpush3.bf16.xpose.msra.mxu0 %v624_v14 }
  0x8e   : > { %532 = vmatprep.subr.bf16.mxu0 %v625_v15 }
  0x95   : > { %533 = vmatpush3.bf16.xpose.msra.mxu0 %v626_v16 }
  0x9c   : > { %535 = vmatmul.mubr.bf16.vlgmr.msra.gmra.mrb[0].mxu0 %v199_v7 }
 0x16f   : > { %v362_v17 = vpop.f32.mrb[0].mxu0 }
 0x170   : > { %369 = vst [vmem:[%s195_s20] sm:$0xff] %v362_v17  ;;  %v364_v18 = vpop.f32.mrb[1].mxu0 }
 0x171   : > { %370 = vst [vmem:[%s195_s20 + $0x8] sm:$0xff] %v364_v18  ;;  %v366_v19 = vpop.f32.mrb[2].mxu0 }
 0x172   : > { %v367_v20 = vpop.f32.mrb[3].mxu0 }
 0x173   : > { %698 = shalt.err (!%p695_p7)
}
 0x174   : > { %s699_s6 = scalar_lea.hbm %s983_s29, 256  ;;  %s703_s19 = scalar_lea.hbm %s1031_s2, 1024 }
 0x175   : > { %p700_p1 = scmp.ne.s32.totalorder %s983_s29, %s699_s6  ;;  %p704_p12 = scmp.lt.u32.totalorder %s983_s29, %s1031_s2 }
 0x176   : > { %p705_p2 = scmp.lt.u32.totalorder %s703_s19, %s699_s6  ;;  %p707_p6 = scmp.lt.u32.totalorder %s699_s6, %s983_s29 }
 0x177   : > { %p701_p4 = pnand %p700_p1, %p1052_p10 }
 0x178   : > { %p706_p8 = por %p705_p2, %p704_p12 }
 0x179   : > { %p702_p5 = pneg %p701_p4 }
 0x17a   : > { %p708_p11 = por %p707_p6, %p706_p8 }
 0x17c   : > { %p709_p13 = pnand %p708_p11, %p702_p5 }
 0x17e   : > { %712 = shalt.err (!%p709_p13)
}
 0x17f   : > { %542 = dma.vmem_to_hbm [thread:$0]  (%p1052_p10), %s978_s23, 256, %s983_s29, %s372_s5  }
 0x180 PF: > { %p559_p0 = scmp.ge.s32.totalorder %s771_s14, 2  ;;  %s400_s4 = sand.u32 1, %s751_s9  }
 0x181   : > { %p1053_p9 = scmp.ne.s32.totalorder %s1042_s22, 0  ;;  %s401_s18 = scalar_lea.sflag [#allocation4], %s400_s4 }
 0x183   : > { %p553_p3 = pnand %p559_p0, %p1053_p9 }
 0x185   : > { %746 = dma.done.wait (!%p553_p3), %s401_s18, 256  }
 0x186   : > { %748 = vsyncadd (!%p553_p3), %s401_s18, 4294967040  ;;  %s19_s14 = sadd.s32 1, %s771_s14   ;;  %s1054_s9 = smov %s755_s10 }
 0x187   : > { %p16_p7 = scmp.ge.s32.totalorder %s19_s14, 6   ;;  %s1055_s10 = smov %s759_s11 }
 0x188   : > { %s1056_s11 = smov %s911_s25  ;;  %s1057_s12 = smov %s767_s13 }
 0x189   : > { %s1058_s13 = smov %s1060_s28  ;;  %18 = sbr.rel (!%p16_p7) target bundleno = 7 (0x7), region = 79 }
 0x190   :  { %406 = vsyncpa [#allocation3], 1 }
 0x191   :  { %408 = vsyncpa [#allocation3 + $0x1], 1 }
 0x192   :  { %409 = vsyncpa [#allocation6], 1 }
 0x193   :  { %411 = vsyncpa [#allocation6 + $0x1], 1 }
 0x194   :  { %412 = vsyncpa [#allocation4], 1 }
 0x195   :  { %414 = vsyncpa [#allocation4 + $0x1], 1 }

</bundles_post_ra>
